<compile_context>
chip_gen: v7x
topology: tpu7x:2x2x1
jax: 0.10.0
libtpu: 0.0.40
codegen_flags: <defaults>
</compile_context>

<pallas_src>
import math

import jax
import jax.numpy as jnp
from jax.experimental import pallas as pl
from jax.experimental.pallas import tpu as pltpu


def _round_up(x, m):
    return ((x + m - 1) // m) * m


def _sinpos_kernel(t_ref, tbl_ref, o_ref):
    # t_ref:   (TB, 1)  f32 timesteps for this row tile
    # tbl_ref: (2, dim) f32, row 0 = freqs tiled twice, row 1 = phase (0 | pi/2)
    # o_ref:   (TB, dim) output tile
    # cos(x) == sin(x + pi/2), so one full-width sin + one lane-dense store covers both halves.
    args = t_ref[...] * tbl_ref[0:1, :] + tbl_ref[1:2, :]   # (TB, dim), VPU broadcast math
    o_ref[...] = jnp.sin(args).astype(o_ref.dtype)


def sinusoidal_position_embeddings(time, dim, *, out_dtype=jnp.float32, use_pallas=None):
    """Pallas TPU implementation of SinusoidalPositionEmbeddings.forward."""
    assert dim % 2 == 0 and dim >= 4, "dim must be even and >= 4"
    B = time.shape[0]
    half = dim // 2
    scale = math.log(10000.0) / (half - 1)
    freqs = jnp.exp(jnp.arange(half, dtype=jnp.float32) * -scale)  # (half,)

    itemsize = jnp.dtype(out_dtype).itemsize

    if use_pallas is None:
        # Pallas only wins when the output is lane-dense (dim >= 128) and big enough
        # that launch + pipeline prologue is amortized; otherwise XLA fuses the jnp
        # version into the downstream timestep MLP for free.
        use_pallas = (dim >= 128) and (B * dim * itemsize >= (2 << 20))

    if not use_pallas:
        args = time.astype(jnp.float32)[:, None] * freqs[None, :]
        return jnp.concatenate([jnp.sin(args), jnp.cos(args)], axis=-1).astype(out_dtype)

    # --- tiling ------------------------------------------------------------------
    # dtype-aware sublane granularity for the output block layout.
    sub = {4: 8, 2: 16, 1: 32}[itemsize]

    # VMEM budget per step (double-buffered): lane-padded time block + output block.
    per_row_bytes = 128 * 4 + dim * itemsize
    tb_vmem = max(sub, (((14 << 20) // (2 * per_row_bytes)) // sub) * sub)

    # Keep the grid >= 2 steps (megacore on v7x + pipelining) when the batch permits,
    # and >= ~8 steps for large batches.
    if B >= 8 * sub:
        target_steps = 8
    elif B >= 2 * sub:
        target_steps = 2
    else:
        target_steps = 1
    if target_steps > 1:
        tb_steps = max(sub, _round_up(-(-B // target_steps), sub))
    else:
        tb_steps = _round_up(B, sub)

    TB = min(tb_vmem, tb_steps, _round_up(B, sub))
    grid = (pl.cdiv(B, TB),)   # last block may overhang B; Pallas masks OOB writes

    t2d = time.astype(jnp.float32).reshape(B, 1)

    # (2, dim) VMEM-resident table: freqs tiled twice + phase offsets.
    freqs_row = jnp.concatenate([freqs, freqs])                                   # (dim,)
    phase_row = jnp.concatenate([jnp.zeros((half,), jnp.float32),
                                 jnp.full((half,), jnp.float32(math.pi / 2.0))])  # (dim,)
    table = jnp.stack([freqs_row, phase_row], axis=0)                             # (2, dim)

    # VMEM accounting with padding: time (TB,1) pads to (TB,128) f32; table (2,dim)
    # pads to (8,dim) f32; everything is double-buffered by the BlockSpec pipeline.
    vmem_limit = int(
        2 * TB * 128 * 4            # time blocks (lane-padded)
        + 2 * 8 * dim * 4           # freq/phase table blocks (sublane-padded)
        + 2 * TB * dim * itemsize   # output blocks
        + (4 << 20)                 # Mosaic internal scratch headroom
    )

    out = pl.pallas_call(
        _sinpos_kernel,
        out_shape=jax.ShapeDtypeStruct((B, dim), out_dtype),
        grid=grid,
        in_specs=[
            pl.BlockSpec((TB, 1), lambda i: (i, 0)),    # per-tile timesteps
            pl.BlockSpec((2, dim), lambda i: (0, 0)),   # same table block every step
        ],
        out_specs=pl.BlockSpec((TB, dim), lambda i: (i, 0)),
        compiler_params=pltpu.CompilerParams(
            dimension_semantics=("parallel",),          # megacore sharding on v7x
            vmem_limit_bytes=vmem_limit,
        ),
        cost_estimate=pl.CostEstimate(
            flops=2 * B * dim,              # mul + add
            transcendentals=B * dim,        # one sin per element
            bytes_accessed=B * 4 + 2 * dim * 4 + B * dim * itemsize,
        ),
    )(t2d, table)

    return out


def _reference(time, dim):
    half = dim // 2
    emb = math.log(10000.0) / (half - 1)
    freqs = jnp.exp(jnp.arange(half, dtype=jnp.float32) * -emb)
    args = time.astype(jnp.float32)[:, None] * freqs[None, :]
    return jnp.concatenate([jnp.sin(args), jnp.cos(args)], axis=-1)


if __name__ == "__main__":
    key = jax.random.PRNGKey(0)

    # Case 1: lane-dense dim, batch divisible by the tile, forced Pallas path.
    B1, dim1 = 16, 256
    t1 = jax.random.uniform(key, (B1,), dtype=jnp.float32) * 1000.0
    out1 = jax.block_until_ready(sinusoidal_position_embeddings(t1, dim1, use_pallas=True))
    ref1 = _reference(t1, dim1)
    assert out1.shape == (B1, dim1)
    # sin(x + fl(pi/2)) vs cos(x): ~half-ulp(|x|) argument rounding for |x| up to ~1e3
    # -> up to ~3e-5 absolute difference, well within 1e-4.
    assert jnp.allclose(out1, ref1, atol=1e-4, rtol=1e-4), "mismatch vs reference (case 1)"

    # Case 2: batch not a multiple of the row tile (multi-step grid + masked edge block).
    B2, dim2 = 20, 128
    t2 = jax.random.uniform(jax.random.PRNGKey(1), (B2,), dtype=jnp.float32) * 1000.0
    out2 = jax.block_until_ready(sinusoidal_position_embeddings(t2, dim2, use_pallas=True))
    ref2 = _reference(t2, dim2)
    assert out2.shape == (B2, dim2)
    assert jnp.allclose(out2, ref2, atol=1e-4, rtol=1e-4), "mismatch vs reference (case 2)"

    # Case 3: bf16 output (halves store bytes on mem-bound v5e/v6e; 16-sublane tiles).
    B3, dim3 = 16, 256
    t3 = jax.random.uniform(jax.random.PRNGKey(2), (B3,), dtype=jnp.float32) * 1000.0
    out3 = jax.block_until_ready(
        sinusoidal_position_embeddings(t3, dim3, out_dtype=jnp.bfloat16, use_pallas=True))
    ref3 = _reference(t3, dim3)
    assert out3.shape == (B3, dim3)
    assert jnp.allclose(out3.astype(jnp.float32), ref3, atol=1.5e-2), "mismatch (case 3, bf16)"

    # Case 4: tiny shape -> default gate falls back to the fused jnp path (exact).
    B4, dim4 = 8, 32
    t4 = jax.random.uniform(jax.random.PRNGKey(3), (B4,), dtype=jnp.float32) * 1000.0
    out4 = jax.block_until_ready(sinusoidal_position_embeddings(t4, dim4))
    ref4 = _reference(t4, dim4)
    assert out4.shape == (B4, dim4)
    assert jnp.allclose(out4, ref4, atol=1e-6), "mismatch vs reference (case 4, jnp path)"

    print("KERNEL_OK")
</pallas_src>

<mosaic_0001>
module attributes {stable_mosaic.version = 11 : i64} {
  func.func @_sinpos_kernel(%arg0: i32, %arg1: memref<8x1xf32, #tpu.memory_space<vmem>>, %arg2: memref<2x256xf32, #tpu.memory_space<vmem>>, %arg3: memref<8x256xf32, #tpu.memory_space<vmem>>) attributes {dimension_semantics = [#tpu.dimension_semantics<parallel>], iteration_bounds = array<i64: 2>, scalar_prefetch = 0 : i64, scratch_operands = 0 : i64, tpu.core_type = #tpu.core_type<tc>, window_params = [{transform_indices = @transform_0, window_bounds = array<i64: 8, 1>}, {pipeline_mode = #tpu.pipeline_mode<synchronous>, transform_indices = @transform_1, window_bounds = array<i64: 2, 256>}, {transform_indices = @transform_2, window_bounds = array<i64: 8, 256>}]} {
    %c0 = arith.constant 0 : index
    %c0_0 = arith.constant 0 : index
    %0 = vector.load %arg1[%c0, %c0_0] : memref<8x1xf32, #tpu.memory_space<vmem>>, vector<8x1xf32>
    %c0_1 = arith.constant 0 : index
    %c0_2 = arith.constant 0 : index
    %1 = vector.load %arg2[%c0_1, %c0_2] : memref<2x256xf32, #tpu.memory_space<vmem>>, vector<1x256xf32>
    %2 = vector.broadcast %0 : vector<8x1xf32> to vector<8x256xf32>
    %3 = vector.broadcast %1 : vector<1x256xf32> to vector<8x256xf32>
    %4 = arith.mulf %2, %3 : vector<8x256xf32>
    %c1 = arith.constant 1 : index
    %c0_3 = arith.constant 0 : index
    %5 = vector.load %arg2[%c1, %c0_3] : memref<2x256xf32, #tpu.memory_space<vmem>>, vector<1x256xf32>
    %6 = vector.broadcast %5 : vector<1x256xf32> to vector<8x256xf32>
    %7 = arith.addf %4, %6 : vector<8x256xf32>
    %8 = math.sin %7 : vector<8x256xf32>
    %c0_4 = arith.constant 0 : index
    %c0_5 = arith.constant 0 : index
    %9 = vector.load %arg3[%c0_4, %c0_5] : memref<8x256xf32, #tpu.memory_space<vmem>>, vector<8x256xf32>
    tpu.vector_store %arg3[%c0_4, %c0_5], %8 {strides = array<i32>} : memref<8x256xf32, #tpu.memory_space<vmem>>, vector<8x256xf32>,
    return
  }
  func.func @transform_0(%arg0: i32) -> (i32, i32) {
    %c0_i32 = arith.constant 0 : i32
    %c0_i32_0 = arith.constant 0 : i32
    return %arg0, %c0_i32 : i32, i32
  }
  func.func @transform_1(%arg0: i32) -> (i32, i32) {
    %c0_i32 = arith.constant 0 : i32
    %c0_i32_0 = arith.constant 0 : i32
    %c0_i32_1 = arith.constant 0 : i32
    return %c0_i32, %c0_i32_0 : i32, i32
  }
  func.func @transform_2(%arg0: i32) -> (i32, i32) {
    %c0_i32 = arith.constant 0 : i32
    %c0_i32_0 = arith.constant 0 : i32
    return %arg0, %c0_i32 : i32, i32
  }
}

</mosaic_0001>

<bundles_post_ra>
// kernel: tpu_custom_call.1
= control target key start
LH: loop header
LB: loop body
LE: loop exit
PB: predicated region body
PF: predicated region fallthrough
CT: control target
= control target key end

     0   :  { %7 = vsyncpa [#allocation3], 0  ;;  %s809_s0 = inlined_call_operand.vmem [shape: f32[16,1], index: 0, kind: input, shape index: {}]   ;;  %s810_s1 = inlined_call_operand.vmem [shape: f32[2,256], index: 1, kind: input, shape index: {}]   ;;  %s811_s2 = inlined_call_operand.hbm [shape: f32[16,256], index: 2, kind: output, shape index: {}]  }
   0x1   :  { %9 = vsyncpa [#allocation3 + $0x1], 0  ;;  %s629_s9 = smov 0   ;;  %s631_s10 = smov 0  }
   0x2   :  { %s633_s11 = smov 0   ;;  %s635_s12 = smov 0  }
   0x3 LB: > { %s650_s13 = sadd.s32 4294967295, %s604_s12   ;;  %s458_s14 = sadd.s32 4294967294, %s604_s12   ;;  %s604_s12 = sphi %s635_s12, %s819_s12   ;;  %s600_s11 = sphi %s633_s11, %s818_s11   ;;  %s596_s10 = sphi %s631_s10, %s817_s10   ;;  %s592_s9 = sphi %s629_s9, %s816_s9  }
   0x4   : > { %s654_s15 = sadd.s32 1, %s604_s12   ;;  %s69_s16 = sadd.s32 1, %s600_s11 }
   0x5   : > { %s66_s17 = ssub.s32 %s604_s12, %s654_s15  ;;  %p79_p0 = scmp.ne.s32.totalorder %s600_s11, %s596_s10 }
   0x6   : > { %p67_p1 = scmp.eq.s32.totalorder %s66_s17, 0  ;;  %p80_p2 = scmp.eq.s32.totalorder %s650_s13, 1 }
   0x7   : > { %p85_p3 = scmp.ne.s32.totalorder %s596_s10, %s592_s9  ;;  %p86_p4 = scmp.eq.s32.totalorder %s458_s14, 1 }
   0x8   : > { %s665_s18 = scalar_select %p67_p1, %s600_s11, %s69_s16  }
   0x9   : > { %p667_p5 = por %p80_p2, %p79_p0  ;;  %p671_p6 = por %p86_p4, %p85_p3 }
   0xa   : > { %p461_p7 = scmp.ge.s32.totalorder %s604_s12, 1  ;;  %p114_p8 = scmp.lt.s32.totalorder %s604_s12, 3 }
   0xc   : > { %p115_p9 = pnand %p461_p7, %p114_p8 }
   0xd   : > { %p135_p10 = scmp.lt.s32.totalorder (!%p115_p9), %s650_s13, 1  ;;  %v606_v0 = vmov (!%p115_p9), 0   ;;  %v147_v2 = vlaneseq (!%p115_p9)  ;;  %v140_v6 = vld [vmem:[%s810_s1] ss:$2 sm:$0x3] (!%p115_p9)  ;;  %s132_s30 = sand.u32 (!%p115_p9), 1, %s596_s10  }
   0xe   : > { %118 = sbr.rel (%p115_p9) target bundleno = 261 (0x105), region = 28  ;;  %533 = vset.pattern.permute.xlu0 (!%p115_p9), %v606_v0  ;;  %v464_v7 = vld [vmem:[%s810_s1 + $0x1] ss:$2 sm:$0x3] (!%p115_p9)  ;;  %v607_v37 = vmov (!%p115_p9), 683565275  }
   0xf   : > { %v148_v3 = vshrl.u32 (!%p115_p9), %v147_v2, 7  ;;  %v608_v41 = vmov (!%p115_p9), 2475754826   ;;  %v609_v43 = vmov (!%p115_p9), 2131351028   ;;  %s462_s3 = sshll.u32 (!%p115_p9), %s132_s30, 4 }
  0x10   : > { %v610_v45 = vmov (!%p115_p9), 2102212464   ;;  %v611_v47 = vmov (!%p115_p9), 920167782   ;;  %v612_v54 = vmov (!%p115_p9), 1326507024  }
  0x11   : > { %v149_v4 = vsub.s32 (!%p115_p9), 0, %v148_v3  ;;  %v153_v5 = vsub.s32 (!%p115_p9), 1, %v148_v3  ;;  %s134_s4 = scalar_lea.vmem (!%p115_p9), [#allocation2], %s462_s3  ;;  %s478_s5 = sshll.u32 (!%p115_p9), %s650_s13, 8 }
  0x12   : > { %s399_s6 = sshll.u32 (!%p115_p9), %s134_s4, 4  ;;  %s765_s14 = scalar_lea.hbm (!%p115_p9), %s811_s2, %s478_s5  ;;  %s767_s6 = int_to_ptr.vmem [resolvable:$true] %s399_s6 }
  0x13   : > { %v150_v8 = vrot.slane (!%p115_p9), %v140_v6, %v149_v4  ;;  %v154_v9 = vrot.slane (!%p115_p9), %v140_v6, %v153_v5  ;;  %v165_v10 = vrot.slane (!%p115_p9), %v464_v7, %v149_v4  ;;  %v169_v11 = vrot.slane (!%p115_p9), %v464_v7, %v153_v5  ;;  %s542_s16 = scalar_lea.vmem (!%p115_p9), %s767_s6, 256  ;;  %s613_s17 = smov (!%p115_p9), [#allocation2]  }
  0x14   : > { %p543_p11 = scmp.ne.s32.totalorder (!%p115_p9), %s767_s6, %s542_s16 }
  0x15   : > { %s136_s21 = scalar_select %p135_p10, %s650_s13, 1 }
  0x16   : > { %s385_s13 = scalar_lea.sflag [#allocation3], %s132_s30  ;;  %p544_p12 = pnand %p543_p11, %p667_p5 }
  0x17   : > { %s463_s22 = sshll.u32 %s136_s21, 3  ;;  %s546_s21 = sshll.u32 %s613_s17, 4  ;;  %s547_s21 = int_to_ptr.vmem [resolvable:$false] %s546_s21 }
  0x18   : > { %s138_s25 = scalar_lea.vmem %s809_s0, %s463_s22  ;;  %p545_p13 = pneg %p544_p12 }
  0x19   : > { %v139_v1 = vld [vmem:[%s138_s25] sm:$0xff]  ;;  %s548_s22 = scalar_lea.vmem %s547_s21, 512  ;;  %p549_p0 = scmp.lt.s32.totalorder %s767_s6, %s547_s21 }
  0x1a   : > { %143 = vperm.xlu0 %533, %v139_v1   ;;  %p550_p1 = scmp.lt.s32.totalorder %s548_s22, %s542_s16 }
  0x1c   : > { %p551_p2 = por %p550_p1, %p549_p0 }
  0x1e   : > { %p552_p3 = pnand %p551_p2, %p545_p13 }
  0x99   : > { %v144_v12 = vpop.permute.xlu0 %143 }
  0x9a   : > { %v157_v13 = vmul.f32 %v150_v8, %v144_v12  ;;  %v158_v14 = vmul.f32 %v154_v9, %v144_v12 }
  0x9c   : > { %v688_v15 = vadd.f32 %v165_v10, %v157_v13  ;;  %v690_v16 = vadd.f32 %v169_v11, %v158_v14 }
  0x9e   : > { %v174_v17 = vand.u32 2147483647, %v688_v15  ;;  %v177_v18 = vand.u32 2139095040, %v688_v15  ;;  %v281_v19 = vand.u32 2139095040, %v690_v16  ;;  %v278_v22 = vand.u32 2147483647, %v690_v16 }
  0x9f   : > { %vm176_vm14 = vcmp.lt.s32.totalorder %v688_v15, 0 }
  0xa0   : > { %v178_v20 = vshrl.u32 %v177_v18, 23  ;;  %v181_v21 = vand.u32 8388607, %v174_v17  ;;  %v282_v23 = vshrl.u32 %v281_v19, 23  ;;  %v700_v28 = vand.u32 8388607, %v278_v22 }
  0xa1   : > { %vm175_vm15 = vcmp.le.f32.partialorder %v174_v17, 0.7853982 }
  0xa2   : > { %v465_v24 = vadd.s32 4294967169, %v178_v20  ;;  %v469_v25 = vadd.s32 4294967169, %v282_v23  ;;  %v182_v27 = vor.u32 8388608, %v181_v21  ;;  %v286_v35 = vor.u32 8388608, %v700_v28 }
  0xa4   : > { %v184_v26 = vadd.s32 1, %v465_v24  ;;  %v288_v29 = vadd.s32 1, %v469_v25  ;;  %v702_v34 = vshll.u32 %v182_v27, 8 }
  0xa6   : > { %vm185_vm0 = vcmp.gt.s32.totalorder %v184_v26, 0  ;;  %vm289_vm1 = vcmp.gt.s32.totalorder %v288_v29, 0 }
  0xa7   : > { %v186_v30 = vsel %vm185_vm0, %v184_v26, 0  ;;  %v290_v33 = vsel %vm289_vm1, %v288_v29, 0  ;;  %v326_v29 = vshll.u32 %v286_v35, 8  ;;  %vm280_vm0 = vcmp.lt.s32.totalorder %v690_v16, 0 }
  0xa8   : > { %v187_v31 = vshrl.u32 %v186_v30, 5  ;;  %v188_v32 = vand.u32 31, %v186_v30  ;;  %v705_v39 = vshrl.u32 %v290_v33, 5  ;;  %v292_v40 = vand.u32 31, %v290_v33 }
  0xa9   : > { %vm747_vm1 = vcmp.le.f32.partialorder %v278_v22, 0.7853982 }
  0xaa   : > { %v189_v36 = vsub.s32 32, %v188_v32  ;;  %v191_v38 = vshll.u32 %v607_v37, %v188_v32  ;;  %v194_v42 = vshll.u32 %v608_v41, %v188_v32  ;;  %v197_v44 = vshll.u32 %v609_v43, %v188_v32 }
  0xab   : > { %v200_v46 = vshll.u32 %v610_v45, %v188_v32  ;;  %v203_v48 = vshll.u32 %v611_v47, %v188_v32  ;;  %vm206_vm2 = vcmp.lt.s32.totalorder %v187_v31, 1  ;;  %vm207_vm3 = vcmp.lt.s32.totalorder %v187_v31, 2 }
  0xac   : > { %v192_v49 = vshrl.u32 %v608_v41, %v189_v36  ;;  %v195_v50 = vshrl.u32 %v609_v43, %v189_v36  ;;  %v198_v51 = vshrl.u32 %v610_v45, %v189_v36  ;;  %v190_v52 = vshrl.u32 %v607_v37, %v189_v36 }
  0xad   : > { %v201_v53 = vshrl.u32 %v611_v47, %v189_v36  ;;  %v204_v55 = vshrl.u32 %v612_v54, %v189_v36  ;;  %v293_v59 = vsub.s32 32, %v292_v40  ;;  %vm208_vm4 = vcmp.lt.s32.totalorder %v187_v31, 3 }
  0xae   : > { %v193_v56 = vor.u32 %v192_v49, %v191_v38  ;;  %v196_v57 = vor.u32 %v195_v50, %v194_v42  ;;  %v199_v58 = vor.u32 %v198_v51, %v197_v44  ;;  %vm209_vm5 = vcmp.lt.s32.totalorder %v187_v31, 4 }
  0xaf   : > { %v202_v60 = vor.u32 %v201_v53, %v200_v46  ;;  %v205_v61 = vor.u32 %v204_v55, %v203_v48  ;;  %v295_v5 = vshll.u32 %v607_v37, %v292_v40  ;;  %v296_v8 = vshrl.u32 %v608_v41, %v293_v59 }
  0xb0   : > { %v210_v62 = vsel %vm206_vm2, %v190_v52, %v193_v56  ;;  %v211_v63 = vsel %vm209_vm5, %v199_v58, 2102212464  ;;  %v214_v0 = vsel %vm206_vm2, %v193_v56, %v196_v57  ;;  %v218_v1 = vsel %vm206_vm2, %v196_v57, %v199_v58 }
  0xb1   : > { %v212_v2 = vsel %vm208_vm4, %v196_v57, %v211_v63  ;;  %v215_v3 = vsel %vm209_vm5, %v202_v60, 920167782  ;;  %v219_v4 = vsel %vm209_vm5, %v205_v61, 1326507024  ;;  %v298_v9 = vshll.u32 %v608_v41, %v292_v40 }
  0xb2   : > { %v216_v6 = vsel %vm208_vm4, %v199_v58, %v215_v3  ;;  %v220_v7 = vsel %vm208_vm4, %v202_v60, %v219_v4  ;;  %v213_v10 = vsel %vm207_vm3, %v210_v62, %v212_v2  ;;  %v299_v13 = vshrl.u32 %v609_v43, %v293_v59 }
  0xb3   : > { %v217_v11 = vsel %vm207_vm3, %v214_v0, %v216_v6  ;;  %v221_v12 = vsel %vm207_vm3, %v218_v1, %v220_v7  ;;  %v297_v21 = vor.u32 %v296_v8, %v295_v5  ;;  %v301_v24 = vshll.u32 %v609_v43, %v292_v40 }
  0xb4   : > { %v714_v14 = vmul.u32.u64.low %v702_v34, %v221_v12  ;;  %v715_v18 = vmul.u32.u64.high %v702_v34, %v221_v12, %v714_v14  ;;  %v718_v19 = vmul.u32.u64.low %v702_v34, %v217_v11  ;;  %v719_v20 = vmul.u32.u64.high %v702_v34, %v217_v11, %v718_v19 }
  0xb5   : > { %v300_v23 = vor.u32 %v299_v13, %v298_v9  ;;  %v302_v25 = vshrl.u32 %v610_v45, %v293_v59  ;;  %v304_v26 = vshll.u32 %v610_v45, %v292_v40  ;;  %v305_v27 = vshrl.u32 %v611_v47, %v293_v59 }
  0xb6   : > { %v308_v28 = vshrl.u32 %v612_v54, %v293_v59  ;;  %v229_v30 = vmul.u32 %v702_v34, %v213_v10  ;;  %v294_v31 = vshrl.u32 %v607_v37, %v293_v59  ;;  %v307_v33 = vshll.u32 %v611_v47, %v292_v40 }
  0xb7   : > { %v303_v32 = vor.u32 %v302_v25, %v301_v24  ;;  %vm231_vm6 = vc.u32 %v715_v18, %v718_v19  ;;  %v232_v36 = vadd.s32 1, %v719_v20  ;;  %v306_v38 = vor.u32 %v305_v27, %v304_v26 }
  0xb8   : > { %vm310_vm7 = vcmp.lt.s32.totalorder %v705_v39, 1  ;;  %v309_v41 = vor.u32 %v308_v28, %v307_v33  ;;  %vm312_vm8 = vcmp.lt.s32.totalorder %v705_v39, 3  ;;  %vm313_vm9 = vcmp.lt.s32.totalorder %v705_v39, 4 }
  0xb9   : > { %v318_v42 = vsel %vm310_vm7, %v297_v21, %v300_v23  ;;  %v233_v35 = vsel %vm231_vm6, %v232_v36, %v719_v20  ;;  %v315_v43 = vsel %vm313_vm9, %v303_v32, 2102212464  ;;  %v319_v34 = vsel %vm313_vm9, %v306_v38, 920167782 }
  0xba   : > { %v322_v37 = vsel %vm310_vm7, %v300_v23, %v303_v32  ;;  %v234_v44 = vadd.s32 %v233_v35, %v229_v30  ;;  %vm311_vm10 = vcmp.lt.s32.totalorder %v705_v39, 2  ;;  %v320_v40 = vsel %vm312_vm8, %v303_v32, %v319_v34 }
  0xbb   : > { %v323_v45 = vsel %vm313_vm9, %v309_v41, 1326507024  ;;  %v314_v46 = vsel %vm310_vm7, %v294_v31, %v297_v21  ;;  %v316_v47 = vsel %vm312_vm8, %v300_v23, %v315_v43  ;;  %v321_v48 = vsel %vm311_vm10, %v318_v42, %v320_v40 }
  0xbc   : > { %v324_v49 = vsel %vm312_vm8, %v306_v38, %v323_v45  ;;  %v235_v50 = vadd.s32 536870912, %v234_v44  ;;  %v729_v52 = vmul.u32.u64.low %v326_v29, %v321_v48  ;;  %v730_v53 = vmul.u32.u64.high %v326_v29, %v321_v48, %v729_v52 }
  0xbd   : > { %v325_v51 = vsel %vm311_vm10, %v322_v37, %v324_v49  ;;  %v317_v57 = vsel %vm311_vm10, %v314_v46, %v316_v47  ;;  %v230_v9 = vadd.s32 %v718_v19, %v715_v18  ;;  %vm266_vm5 = vweird.f32 %v688_v15 }
  0xbe   : > { %v732_v54 = vmul.u32.u64.low %v326_v29, %v325_v51  ;;  %v733_v55 = vmul.u32.u64.high %v326_v29, %v325_v51, %v732_v54  ;;  %v236_v56 = vshrl.u32 %v235_v50, 30  ;;  %v336_v59 = vadd.s32 1, %v730_v53 }
  0xbf   : > { %v333_v39 = vmul.u32 %v326_v29, %v317_v57  ;;  %vm370_vm9 = vweird.f32 %v690_v16 }
  0xc0   : > { %v237_v58 = vshll.u32 %v236_v56, 30  ;;  %vm335_vm11 = vc.u32 %v733_v55, %v729_v52  ;;  %v334_v30 = vadd.s32 %v729_v52, %v733_v55  ;;  %v260_v19 = vsub.s32 4, %v236_v56 }
  0xc1   : > { %v337_v61 = vsel %vm335_vm11, %v336_v59, %v730_v53 }
  0xc2   : > { %v238_v60 = vsub.s32 %v234_v44, %v237_v58  ;;  %v338_v62 = vadd.s32 %v337_v61, %v333_v39  ;;  %v261_v34 = vsel %vm176_vm14, %v260_v19, %v236_v56 }
  0xc3   : > { %v263_v46 = vsel %vm175_vm15, 0, %v261_v34 }
  0xc4   : > { %v240_v63 = vsub.s32 0, %v238_v60  ;;  %v339_v0 = vadd.s32 536870912, %v338_v62  ;;  %v267_v49 = vadd.s32 3, %v263_v46 }
  0xc6   : > { %v466_v1 = vmin.u32 %v240_v63, %v238_v60  ;;  %v340_v2 = vshrl.u32 %v339_v0, 30  ;;  %v268_v54 = vand.u32 3, %v267_v49 }
  0xc8   : > { %v242_v3 = vclz %v466_v1  ;;  %v341_v4 = vshll.u32 %v340_v2, 30  ;;  %v364_v48 = vsub.s32 4, %v340_v2  ;;  %vm273_vm2 = vcmp.eq.s32.totalorder %v268_v54, 2 }
  0xc9   : > { %vm270_vm3 = vcmp.eq.s32.totalorder %v268_v54, 0  ;;  %vm269_vm4 = vcmp.lt.s32.totalorder %v268_v54, 2 }
  0xca   : > { %v467_v5 = vadd.s32 4294967294, %v242_v3  ;;  %v342_v6 = vsub.s32 %v338_v62, %v341_v4  ;;  %v365_v52 = vsel %vm280_vm0, %v364_v48, %v340_v2 }
  0xcb   : > { %v367_v56 = vsel %vm747_vm1, 0, %v365_v52 }
  0xcc   : > { %vm468_vm12 = vcmp.lt.s32.totalorder %v467_v5, 0  ;;  %v344_v8 = vsub.s32 0, %v342_v6  ;;  %v371_v39 = vadd.s32 3, %v367_v56 }
  0xcd   : > { %v245_v7 = vsel %vm468_vm12, 0, %v467_v5 }
  0xce   : > { %v246_v10 = vsub.s32 32, %v245_v7  ;;  %v250_v11 = vsub.s32 4294967266, %v245_v7  ;;  %v470_v12 = vmin.u32 %v344_v8, %v342_v6  ;;  %v247_v13 = vshll.u32 %v238_v60, %v245_v7 }
  0xcf   : > { %v372_v63 = vand.u32 3, %v371_v39 }
  0xd0   : > { %v248_v14 = vshrl.u32 %v230_v9, %v246_v10  ;;  %v251_v20 = vadd.s32 127, %v250_v11  ;;  %v346_v21 = vclz %v470_v12 }
  0xd1   : > { %vm377_vm6 = vcmp.eq.s32.totalorder %v372_v63, 2  ;;  %vm374_vm7 = vcmp.eq.s32.totalorder %v372_v63, 0  ;;  %vm373_vm8 = vcmp.lt.s32.totalorder %v372_v63, 2 }
  0xd2   : > { %v249_v23 = vor.u32 %v248_v14, %v247_v13  ;;  %v252_v24 = vshll.u32 %v251_v20, 23  ;;  %v471_v25 = vadd.s32 4294967294, %v346_v21 }
  0xd4   : > { %v253_v26 = vor.u32 4788187, %v252_v24  ;;  %vm472_vm13 = vcmp.lt.s32.totalorder %v471_v25, 0  ;;  %v256_v28 = vcvt.s32.f32 %v249_v23 }
  0xd5   : > { %v349_v29 = vsel %vm472_vm13, 0, %v471_v25 }
  0xd6   : > { %v254_v27 = vand.u32 2147483647, %v253_v26  ;;  %v350_v31 = vsub.s32 32, %v349_v29  ;;  %v354_v32 = vsub.s32 4294967266, %v349_v29  ;;  %v351_v33 = vshll.u32 %v342_v6, %v349_v29 }
  0xd8   : > { %v257_v18 = vmul.f32 %v256_v28, %v254_v27  ;;  %v352_v36 = vshrl.u32 %v334_v30, %v350_v31  ;;  %v355_v38 = vadd.s32 127, %v354_v32 }
  0xda   : > { %v258_v41 = vxor.u32 2147483648, %v257_v18  ;;  %v353_v42 = vor.u32 %v352_v36, %v351_v33  ;;  %v356_v35 = vshll.u32 %v355_v38, 23 }
  0xdc   : > { %v259_v43 = vsel %vm176_vm14, %v258_v41, %v257_v18  ;;  %v357_v44 = vor.u32 4788187, %v356_v35  ;;  %v360_v45 = vcvt.s32.f32 %v353_v42 }
  0xdd   : > { %v262_v37 = vsel %vm175_vm15, %v688_v15, %v259_v43 }
  0xde   : > { %534 = vcosq.f32 %v262_v37  ;;  %v358_v40 = vand.u32 2147483647, %v357_v44 }
  0xdf   : > { %536 = vsinq.f32 %v262_v37 }
  0xe0   : > { %v361_v47 = vmul.f32 %v360_v45, %v358_v40 }
  0xe2   : > { %v362_v50 = vxor.u32 2147483648, %v361_v47 }
  0xe4   : > { %v363_v51 = vsel %vm280_vm0, %v362_v50, %v361_v47 }
  0xe5   : > { %v366_v53 = vsel %vm747_vm1, %v690_v16, %v363_v51 }
  0xe6   : > { %538 = vcosq.f32 %v366_v53 }
  0xe7   : > { %540 = vsinq.f32 %v366_v53 }
  0xe8   : > { %v535_v55 = vpop.eup %534 }
  0xe9   : > { %v537_v57 = vpop.eup %536  ;;  %v274_v22 = vxor.u32 2147483648, %v535_v55 }
  0xea   : > { %v271_v58 = vxor.u32 2147483648, %v537_v57 }
  0xeb   : > { %v275_v59 = vsel %vm273_vm2, %v274_v22, %v537_v57 }
  0xec   : > { %v272_v60 = vsel %vm270_vm3, %v535_v55, %v271_v58 }
  0xed   : > { %v276_v61 = vsel %vm269_vm4, %v272_v60, %v275_v59 }
  0xee   : > { %v277_v62 = vsel %vm266_vm5, nan, %v276_v61 }
  0xef   : > { %382 = vst [vmem:[%s134_s4] sm:$0xff] %v277_v62 }
  0xf0   : > { %v539_v0 = vpop.eup %538 }
  0xf1   : > { %v541_v1 = vpop.eup %540  ;;  %v378_v2 = vxor.u32 2147483648, %v539_v0 }
  0xf2   : > { %v375_v3 = vxor.u32 2147483648, %v541_v1 }
  0xf3   : > { %v379_v4 = vsel %vm377_vm6, %v378_v2, %v541_v1 }
  0xf4   : > { %v376_v5 = vsel %vm374_vm7, %v539_v0, %v375_v3 }
  0xf5   : > { %v380_v15 = vsel %vm373_vm8, %v376_v5, %v379_v4 }
  0xf6   : > { %v381_v6 = vsel %vm370_vm9, nan, %v380_v15 }
  0xf7   : > { %383 = vst [vmem:[%s134_s4 + $0x8] sm:$0xff] %v381_v6 }
  0xf8   : > { %555 = shalt.err (!%p552_p3)
}
  0xf9   : > { %s556_s23 = scalar_lea.hbm %s765_s14, 256  ;;  %s560_s26 = scalar_lea.hbm %s811_s2, 512 }
  0xfa   : > { %p557_p4 = scmp.ne.s32.totalorder %s765_s14, %s556_s23  ;;  %p561_p9 = scmp.lt.u32.totalorder %s765_s14, %s811_s2 }
  0xfb   : > { %p562_p10 = scmp.lt.u32.totalorder %s560_s26, %s556_s23  ;;  %p564_p12 = scmp.lt.u32.totalorder %s556_s23, %s765_s14 }
  0xfc   : > { %p558_p7 = pnand %p557_p4, %p667_p5 }
  0xfd   : > { %p563_p11 = por %p562_p10, %p561_p9 }
  0xfe   : > { %p559_p8 = pneg %p558_p7 }
  0xff   : > { %p565_p13 = por %p564_p12, %p563_p11 }
 0x101   : > { %p566_p0 = pnand %p565_p13, %p559_p8 }
 0x103   : > { %569 = shalt.err (!%p566_p0)
}
 0x104   : > { %487 = dma.vmem_to_hbm [thread:$0]  (%p667_p5), %s767_s6, 256, %s765_s14, %s385_s13  }
 0x105 PF: > { %p493_p1 = scmp.ge.s32.totalorder %s604_s12, 2  ;;  %s411_s29 = sand.u32 1, %s592_s9  }
 0x106   : > { %s412_s30 = scalar_lea.sflag [#allocation3], %s411_s29 }
 0x107   : > { %p490_p2 = pnand %p493_p1, %p671_p6 }
 0x109   : > { %587 = dma.done.wait (!%p490_p2), %s412_s30, 256  }
 0x10a   : > { %589 = vsyncadd (!%p490_p2), %s412_s30, 4294967040  ;;  %p12_p3 = scmp.ge.s32.totalorder %s654_s15, 4   ;;  %s816_s9 = smov %s596_s10 }
 0x10b   : > { %s817_s10 = smov %s600_s11  ;;  %s818_s11 = smov %s665_s18 }
 0x10c   : > { %s819_s12 = smov %s654_s15  ;;  %14 = sbr.rel (!%p12_p3) target bundleno = 3 (0x3), region = 64 }
 0x113   :  { %417 = vsyncpa [#allocation3], 1 }
 0x114   :  { %419 = vsyncpa [#allocation3 + $0x1], 1 }

</bundles_post_ra>
